<compile_context>
chip_gen: v5e
topology: v5e:2x2
jax: 0.10.0
libtpu: 0.0.40
codegen_flags: <defaults>
</compile_context>

<pallas_src>
import functools

import jax
import jax.numpy as jnp
from jax.experimental import pallas as pl
from jax.experimental.pallas import tpu as pltpu

_VMEM_LIMIT_BYTES = 32 * 1024 * 1024          # declared to Mosaic (legal on v5e/v6e/v7x)
_DEFAULT_BLOCK_BUDGET = 12 * 1024 * 1024      # double-buffered in+out blocks


def _pick_tiles(B, C_in, C_out, H, W, itemsize, budget):
    """Choose (b_tile, h_tile) for NCHW blocks (b_tile, C, h_tile, W).

    Rules:
      * h_tile is a multiple of 8 dividing H, or H itself (block-shape rule).
      * double-buffered in+out block bytes (with lane/sublane padding) <= budget.
      * prefer the fewest grid steps (largest blocks); but if the tensor is
        large enough to be worth sharding, require >= 2 total steps so v7x's
        two TensorCores both get work.
    """
    sub = max(32 // itemsize, 8)                 # native sublane tile (8 f32, 16 bf16)
    pw = -(-W // 128) * 128                      # lane-padded W

    def blk_bytes(b, h):
        ph = -(-h // sub) * sub
        return 2 * (C_in + C_out) * b * ph * pw * itemsize

    h_cands = sorted({H} | {h for h in range(8, H, 8) if H % h == 0}, reverse=True)
    b_cands = sorted({d for d in range(1, B + 1) if B % d == 0}, reverse=True)

    total_bytes = (C_in + C_out) * B * H * W * itemsize
    want_split = total_bytes > (128 << 10)       # only shard non-trivial work

    best_any = best_split = None
    best_any_steps = best_split_steps = None
    for b in b_cands:
        for h in h_cands:
            if blk_bytes(b, h) > budget:
                continue
            steps = (B // b) * (H // h)
            if best_any is None or steps < best_any_steps:
                best_any, best_any_steps = (b, h), steps
            if steps >= 2 and (best_split is None or steps < best_split_steps):
                best_split, best_split_steps = (b, h), steps

    if want_split and best_split is not None:
        return best_split
    if best_any is not None:
        return best_any
    # Nothing fits the budget (pathologically large C*W): smallest legal block.
    return (1, h_cands[-1])


def _addcoords_kernel(x_ref, o_ref, *, H, W, with_r):
    """x_ref: (b_tile, C, h_tile, W);  o_ref: (b_tile, C_out, h_tile, W)."""
    b_tile, C, h_tile, _ = x_ref.shape
    hi = pl.program_id(1)

    # --- passthrough of the C input channels --------------------------------
    # Channel is a leading (non-tiled) dim, so this is whole-(h,W)-slab copies.
    o_ref[:, :C, :, :] = x_ref[...]

    # --- coordinate channels -------------------------------------------------
    # Sublane/lane-dense (1, 1, h_tile, W) planes from 2-D iotas.
    h_idx = (jax.lax.broadcasted_iota(jnp.int32, (1, 1, h_tile, W), 2)
             + hi * h_tile).astype(jnp.float32)
    w_idx = jax.lax.broadcasted_iota(
        jnp.int32, (1, 1, h_tile, W), 3).astype(jnp.float32)

    # PyTorch normalizes by (x_dim-1)/(y_dim-1); guard degenerate dims (torch
    # would produce inf/NaN for H==1 or W==1 — documented divergence).
    sx = 2.0 / max(H - 1, 1)
    sy = 2.0 / max(W - 1, 1)
    xx = h_idx * sx - 1.0          # varies along H (x_dim)
    yy = w_idx * sy - 1.0          # varies along W (y_dim)

    coords = [xx, yy]
    if with_r:
        coords.append(jnp.sqrt((xx - 0.5) ** 2 + (yy - 0.5) ** 2))
    coord_blk = jnp.concatenate(coords, axis=1).astype(o_ref.dtype)
    coord_blk = jnp.broadcast_to(coord_blk, (b_tile,) + coord_blk.shape[1:])

    # One store for all coordinate channels.
    o_ref[:, C:, :, :] = coord_blk


def add_coords(x: jax.Array, with_r: bool = False, *,
               vmem_block_budget_bytes: int = _DEFAULT_BLOCK_BUDGET) -> jax.Array:
    """Pallas implementation of AddCoords.forward.  x is NCHW."""
    B, C, H, W = x.shape
    n_coord = 3 if with_r else 2
    C_out = C + n_coord

    b_tile, h_tile = _pick_tiles(B, C, C_out, H, W, x.dtype.itemsize,
                                 vmem_block_budget_bytes)
    grid = (B // b_tile, H // h_tile)

    kernel = functools.partial(_addcoords_kernel, H=H, W=W, with_r=with_r)

    return pl.pallas_call(
        kernel,
        out_shape=jax.ShapeDtypeStruct((B, C_out, H, W), x.dtype),
        grid=grid,
        in_specs=[pl.BlockSpec((b_tile, C, h_tile, W),
                               lambda bi, hi: (bi, 0, hi, 0))],
        out_specs=pl.BlockSpec((b_tile, C_out, h_tile, W),
                               lambda bi, hi: (bi, 0, hi, 0)),
        compiler_params=pltpu.CompilerParams(
            dimension_semantics=("parallel", "parallel"),
            vmem_limit_bytes=_VMEM_LIMIT_BYTES),
    )(x)


def _add_coords_ref(x: jax.Array, with_r: bool = False) -> jax.Array:
    """Pure-JAX reference mirroring the PyTorch AddCoords semantics."""
    B, C, H, W = x.shape
    hh = jnp.arange(H, dtype=jnp.float32)[:, None]   # (H, 1)
    ww = jnp.arange(W, dtype=jnp.float32)[None, :]   # (1, W)
    xx32 = jnp.broadcast_to((hh / max(H - 1, 1)) * 2.0 - 1.0, (H, W))
    yy32 = jnp.broadcast_to((ww / max(W - 1, 1)) * 2.0 - 1.0, (H, W))
    xx = jnp.broadcast_to(xx32.astype(x.dtype)[None, None], (B, 1, H, W))
    yy = jnp.broadcast_to(yy32.astype(x.dtype)[None, None], (B, 1, H, W))
    parts = [x, xx, yy]
    if with_r:
        rr32 = jnp.sqrt((xx32 - 0.5) ** 2 + (yy32 - 0.5) ** 2)
        parts.append(jnp.broadcast_to(rr32.astype(x.dtype)[None, None],
                                      (B, 1, H, W)))
    return jnp.concatenate(parts, axis=1)


def _check(x, with_r=False, atol=1e-5, rtol=1e-5, **kw):
    out = jax.block_until_ready(add_coords(x, with_r=with_r, **kw))
    ref = _add_coords_ref(x, with_r=with_r)
    assert out.shape == ref.shape, (out.shape, ref.shape)
    ok = jnp.allclose(out.astype(jnp.float32), ref.astype(jnp.float32),
                      atol=atol, rtol=rtol)
    assert ok, (f"mismatch vs reference (with_r={with_r}, "
                f"shape={x.shape}, dtype={x.dtype})")


if __name__ == "__main__":
    key = jax.random.PRNGKey(0)
    k1, k2, k3, k4 = jax.random.split(key, 4)

    # Deep-layer style feature map (small spatial; batch folded into one block).
    x = jax.random.normal(k1, (2, 4, 16, 16), dtype=jnp.float32)
    _check(x, with_r=False)
    _check(x, with_r=True)

    # Larger spatial map: multi-step grid (h_tile < H) + >=2 parallel steps
    # for v7x megacore sharding.
    x2 = jax.random.normal(k2, (1, 4, 64, 128), dtype=jnp.float32)
    _check(x2, with_r=False)

    # Tiny block budget -> forces h_tile=8 and an 8-step pipelined grid.
    _check(x2, with_r=False, vmem_block_budget_bytes=100_000)

    # Odd W (not a multiple of 128), with_r path.
    x3 = jax.random.normal(k3, (2, 3, 8, 24), dtype=jnp.float32)
    _check(x3, with_r=True)

    # bf16 passthrough / coordinate-cast path.
    x4 = jax.random.normal(k4, (2, 4, 16, 16), dtype=jnp.bfloat16)
    _check(x4, with_r=False, atol=1e-2, rtol=1e-2)

    print("KERNEL_OK")
</pallas_src>

<mosaic_0001>
module attributes {stable_mosaic.version = 11 : i64} {
  func.func @_addcoords_kernel(%arg0: i32, %arg1: i32, %arg2: memref<2x4x16x16xf32, #tpu.memory_space<vmem>>, %arg3: memref<2x6x16x16xf32, #tpu.memory_space<vmem>>) attributes {dimension_semantics = [#tpu.dimension_semantics<parallel>, #tpu.dimension_semantics<parallel>], iteration_bounds = array<i64: 1, 1>, scalar_prefetch = 0 : i64, scratch_operands = 0 : i64, tpu.core_type = #tpu.core_type<tc>, window_params = [{transform_indices = @transform_0, window_bounds = array<i64: 2, 4, 16, 16>}, {transform_indices = @transform_1, window_bounds = array<i64: 2, 6, 16, 16>}]} {
    %c0 = arith.constant 0 : index
    %c0_0 = arith.constant 0 : index
    %c0_1 = arith.constant 0 : index
    %c0_2 = arith.constant 0 : index
    %0 = vector.load %arg2[%c0, %c0_0, %c0_1, %c0_2] : memref<2x4x16x16xf32, #tpu.memory_space<vmem>>, vector<2x4x16x16xf32>
    %c0_3 = arith.constant 0 : index
    %c0_4 = arith.constant 0 : index
    %c0_5 = arith.constant 0 : index
    %c0_6 = arith.constant 0 : index
    %1 = vector.load %arg3[%c0_3, %c0_4, %c0_5, %c0_6] : memref<2x6x16x16xf32, #tpu.memory_space<vmem>>, vector<2x4x16x16xf32>
    tpu.vector_store %arg3[%c0_3, %c0_4, %c0_5, %c0_6], %0 {strides = array<i32>} : memref<2x6x16x16xf32, #tpu.memory_space<vmem>>, vector<2x4x16x16xf32>,
    %2 = tpu.iota {dimensions = array<i32: 2>} : vector<1x1x16x16xi32>
    %c16_i32 = arith.constant 16 : i32
    %3 = arith.muli %arg1, %c16_i32 : i32
    %4 = vector.broadcast %3 : i32 to vector<1x1x16x16xi32>
    %5 = arith.addi %2, %4 : vector<1x1x16x16xi32>
    %6 = arith.sitofp %5 : vector<1x1x16x16xi32> to vector<1x1x16x16xf32>
    %7 = tpu.iota {dimensions = array<i32: 3>} : vector<1x1x16x16xi32>
    %8 = arith.sitofp %7 : vector<1x1x16x16xi32> to vector<1x1x16x16xf32>
    %cst = arith.constant 0.13333334 : f32
    %9 = vector.broadcast %cst : f32 to vector<1x1x16x16xf32>
    %10 = arith.mulf %6, %9 : vector<1x1x16x16xf32>
    %cst_7 = arith.constant 1.000000e+00 : f32
    %11 = vector.broadcast %cst_7 : f32 to vector<1x1x16x16xf32>
    %12 = arith.subf %10, %11 : vector<1x1x16x16xf32>
    %cst_8 = arith.constant 0.13333334 : f32
    %13 = vector.broadcast %cst_8 : f32 to vector<1x1x16x16xf32>
    %14 = arith.mulf %8, %13 : vector<1x1x16x16xf32>
    %cst_9 = arith.constant 1.000000e+00 : f32
    %15 = vector.broadcast %cst_9 : f32 to vector<1x1x16x16xf32>
    %16 = arith.subf %14, %15 : vector<1x1x16x16xf32>
    %17 = tpu.concatenate %12, %16 in 1 : vector<1x1x16x16xf32>, vector<1x1x16x16xf32> -> vector<1x2x16x16xf32>
    %18 = vector.shape_cast %17 : vector<1x2x16x16xf32> to vector<1x2x16x16xf32>
    %19 = vector.broadcast %18 : vector<1x2x16x16xf32> to vector<2x2x16x16xf32>
    %c0_10 = arith.constant 0 : index
    %c4 = arith.constant 4 : index
    %c0_11 = arith.constant 0 : index
    %c0_12 = arith.constant 0 : index
    %20 = vector.load %arg3[%c0_10, %c4, %c0_11, %c0_12] : memref<2x6x16x16xf32, #tpu.memory_space<vmem>>, vector<2x2x16x16xf32>
    tpu.vector_store %arg3[%c0_10, %c4, %c0_11, %c0_12], %19 {strides = array<i32>} : memref<2x6x16x16xf32, #tpu.memory_space<vmem>>, vector<2x2x16x16xf32>,
    return
  }
  func.func @transform_0(%arg0: i32, %arg1: i32) -> (i32, i32, i32, i32) {
    %c0_i32 = arith.constant 0 : i32
    %c0_i32_0 = arith.constant 0 : i32
    %c0_i32_1 = arith.constant 0 : i32
    return %arg0, %c0_i32, %arg1, %c0_i32_0 : i32, i32, i32, i32
  }
  func.func @transform_1(%arg0: i32, %arg1: i32) -> (i32, i32, i32, i32) {
    %c0_i32 = arith.constant 0 : i32
    %c0_i32_0 = arith.constant 0 : i32
    %c0_i32_1 = arith.constant 0 : i32
    return %arg0, %c0_i32, %arg1, %c0_i32_0 : i32, i32, i32, i32
  }
}

</mosaic_0001>

<bundles_post_ra>
// kernel: tpu_custom_call.1
= control target key start
LH: loop header
LB: loop body
LE: loop exit
PB: predicated region body
PF: predicated region fallthrough
CT: control target
= control target key end

     0   :  { %6 = vsyncpa [#allocation3], 0  ;;  %s213_s0 = inlined_call_operand.hbm [shape: f32[2,4,16,16], index: 0, kind: input, shape index: {}]   ;;  %s214_s1 = inlined_call_operand.hbm [shape: f32[2,6,16,16], index: 1, kind: output, shape index: {}]  }
   0x1   :  { %7 = vsyncpa [#allocation4], 0  ;;  %s12_s8 = sshll.u32 %s213_s0, 4  ;;  %s163_s9 = smov [#allocation2]   ;;  %s13_s8 = int_to_ptr.hbm [resolvable:$true] %s12_s8 }
   0x2   :  { %s14_s10 = sshll.u32 %s163_s9, 4  ;;  %s164_s11 = smov 128   ;;  %s15_s10 = int_to_ptr.vmem [resolvable:$true] %s14_s10 }
   0x3   :  { %s165_s12 = smov 8  }
   0x4   :  { %20 = dma.hbm_to_vmem [thread:$0]  %s13_s8, 2048, %s15_s10, [#allocation3], %s164_s11, %s164_s11, %s165_s12  }
   0x5   :  { %159 = dma.done.wait [#allocation3], 2048  }
   0x6   :  { %160 = vsyncadd [#allocation3], 4294965248  ;;  %v58_v0 = vlaneseq  ;;  %vm41_vm0 = vcmask 130048   ;;  %v25_v2 = vld [vmem:[#allocation2] sm:$0xff]  ;;  %v26_v3 = vld [vmem:[#allocation2 + $0x8] sm:$0xff]  ;;  %s166_s0 = smov [#allocation5]  }
   0x7   :  { %v27_v4 = vld [vmem:[#allocation2 + $0x10] sm:$0xff]  ;;  %42 = vst.msk [vmem:[#allocation5] sm:$0xff] %vm41_vm0, %v25_v2  ;;  %v28_v5 = vld [vmem:[#allocation2 + $0x18] sm:$0xff]  ;;  %v29_v6 = vld [vmem:[#allocation2 + $0x20] sm:$0xff]  ;;  %s89_s13 = sshll.u32 %s166_s0, 4  ;;  %s91_s16 = sshll.u32 %s214_s1, 4  ;;  %s90_s13 = int_to_ptr.vmem [resolvable:$true] %s89_s13  ;;  %s92_s16 = int_to_ptr.hbm [resolvable:$true] %s91_s16 }
   0x8   :  { %v59_v1 = vshrl.u32 %v58_v0, 7  ;;  %43 = vst.msk [vmem:[#allocation5 + $0x8] sm:$0xff] %vm41_vm0, %v26_v3  ;;  %v30_v7 = vld [vmem:[#allocation2 + $0x28] sm:$0xff]  ;;  %v31_v9 = vld [vmem:[#allocation2 + $0x30] sm:$0xff]  ;;  %v32_v10 = vld [vmem:[#allocation2 + $0x38] sm:$0xff]  ;;  %v68_v12 = vand.u32 127, %v58_v0 }
   0x9   :  { %44 = vst.msk [vmem:[#allocation5 + $0x10] sm:$0xff] %vm41_vm0, %v27_v4  ;;  %v33_v13 = vld [vmem:[#allocation2 + $0x40] sm:$0xff]  ;;  %v34_v14 = vld [vmem:[#allocation2 + $0x48] sm:$0xff]  ;;  %v35_v16 = vld [vmem:[#allocation2 + $0x50] sm:$0xff] }
   0xa   :  { %v60_v8 = vadd.s32 8, %v59_v1  ;;  %45 = vst.msk [vmem:[#allocation5 + $0x18] sm:$0xff] %vm41_vm0, %v28_v5  ;;  %v65_v11 = vcvt.s32.f32 %v59_v1  ;;  %v36_v17 = vld [vmem:[#allocation2 + $0x58] sm:$0xff]  ;;  %v69_v19 = vcvt.s32.f32 %v68_v12  ;;  %v37_v20 = vld [vmem:[#allocation2 + $0x60] sm:$0xff]  ;;  %v38_v21 = vld [vmem:[#allocation2 + $0x68] sm:$0xff] }
   0xb   :  { %46 = vst.msk [vmem:[#allocation5 + $0x20] sm:$0xff] %vm41_vm0, %v29_v6  ;;  %v39_v23 = vld [vmem:[#allocation2 + $0x70] sm:$0xff]  ;;  %v40_v24 = vld [vmem:[#allocation2 + $0x78] sm:$0xff] }
   0xc   :  { %47 = vst.msk [vmem:[#allocation5 + $0x28] sm:$0xff] %vm41_vm0, %v30_v7  ;;  %v66_v15 = vcvt.s32.f32 %v60_v8  ;;  %v70_v18 = vmul.f32 0.13333334, %v65_v11  ;;  %v74_v26 = vmul.f32 0.13333334, %v69_v19 }
   0xd   :  { %48 = vst.msk [vmem:[#allocation5 + $0x30] sm:$0xff] %vm41_vm0, %v31_v9 }
   0xe   :  { %49 = vst.msk [vmem:[#allocation5 + $0x38] sm:$0xff] %vm41_vm0, %v32_v10  ;;  %v71_v22 = vmul.f32 0.13333334, %v66_v15  ;;  %v104_v25 = vadd.f32 -1.0, %v70_v18  ;;  %v106_v28 = vadd.f32 -1.0, %v74_v26 }
   0xf   :  { %50 = vst.msk [vmem:[#allocation5 + $0x60] sm:$0xff] %vm41_vm0, %v33_v13 }
  0x10   :  { %51 = vst.msk [vmem:[#allocation5 + $0x68] sm:$0xff] %vm41_vm0, %v34_v14  ;;  %v105_v27 = vadd.f32 -1.0, %v71_v22 }
  0x11   :  { %52 = vst.msk [vmem:[#allocation5 + $0x70] sm:$0xff] %vm41_vm0, %v35_v16 }
  0x12   :  { %53 = vst.msk [vmem:[#allocation5 + $0x78] sm:$0xff] %vm41_vm0, %v36_v17 }
  0x13   :  { %54 = vst.msk [vmem:[#allocation5 + $0x80] sm:$0xff] %vm41_vm0, %v37_v20 }
  0x14   :  { %55 = vst.msk [vmem:[#allocation5 + $0x88] sm:$0xff] %vm41_vm0, %v38_v21 }
  0x15   :  { %56 = vst.msk [vmem:[#allocation5 + $0x90] sm:$0xff] %vm41_vm0, %v39_v23 }
  0x16   :  { %57 = vst.msk [vmem:[#allocation5 + $0x98] sm:$0xff] %vm41_vm0, %v40_v24 }
  0x17   :  { %77 = vst.msk [vmem:[#allocation5 + $0x40] sm:$0xff] %vm41_vm0, %v104_v25 }
  0x18   :  { %81 = vst.msk [vmem:[#allocation5 + $0xa0] sm:$0xff] %vm41_vm0, %v104_v25 }
  0x19   :  { %78 = vst.msk [vmem:[#allocation5 + $0x48] sm:$0xff] %vm41_vm0, %v105_v27 }
  0x1a   :  { %82 = vst.msk [vmem:[#allocation5 + $0xa8] sm:$0xff] %vm41_vm0, %v105_v27 }
  0x1b   :  { %79 = vst.msk [vmem:[#allocation5 + $0x50] sm:$0xff] %vm41_vm0, %v106_v28 }
  0x1c   :  { %80 = vst.msk [vmem:[#allocation5 + $0x58] sm:$0xff] %vm41_vm0, %v106_v28 }
  0x1d   :  { %83 = vst.msk [vmem:[#allocation5 + $0xb0] sm:$0xff] %vm41_vm0, %v106_v28 }
  0x1e   :  { %84 = vst.msk [vmem:[#allocation5 + $0xb8] sm:$0xff] %vm41_vm0, %v106_v28 }
  0x1f   :  { %97 = dma.vmem_to_hbm [thread:$0]  %s90_s13, 3072, %s92_s16, [#allocation4], %s164_s11, %s164_s11, %s165_s12  }
  0x20   :  { %161 = dma.done.wait [#allocation4], 3072  }
  0x21   :  { %162 = vsyncadd [#allocation4], 4294964224 }
  0x22   :  { %102 = vsyncpa [#allocation3], 1 }
  0x23   :  { %103 = vsyncpa [#allocation4], 1 }

</bundles_post_ra>
